<compile_context>
chip_gen: v6e
topology: v6e:2x2x1
jax: 0.10.0
libtpu: 0.0.40
codegen_flags: <defaults>
</compile_context>

<pallas_src>
import jax
import jax.numpy as jnp
from jax.experimental import pallas as pl
from jax.experimental.pallas import tpu as pltpu


def _round_up(n, m):
    return ((n + m - 1) // m) * m


def mlp_kernel(x_ref,
               w1_ref, b1_ref,
               w2_ref, b2_ref,
               w3_ref, b3_ref,
               w4_ref, b4_ref,
               o_ref):
    neg_slope = jnp.float32(0.01)  # default negative_slope of F.leaky_relu

    def leaky_relu(v):
        return jnp.where(v > 0, v, neg_slope * v)

    # In-kernel f32 -> bf16 cast (VPU work hidden under the input DMA); avoids a
    # separate wrapper-side cast pass over x in HBM.
    x = x_ref[...].astype(jnp.bfloat16)

    # hidden1 (+bn1 folded) -> leaky_relu          (dropout = identity in eval)
    h = jnp.dot(x, w1_ref[...], preferred_element_type=jnp.float32) + b1_ref[...]
    h = leaky_relu(h)

    # hidden2 (+bn2 folded) -> leaky_relu
    h = jnp.dot(h.astype(jnp.bfloat16), w2_ref[...],
                preferred_element_type=jnp.float32) + b2_ref[...]
    h = leaky_relu(h)

    # hidden3 (+bn3 folded) -> leaky_relu
    h = jnp.dot(h.astype(jnp.bfloat16), w3_ref[...],
                preferred_element_type=jnp.float32) + b3_ref[...]
    h = leaky_relu(h)

    # Output layer: contract K=32 of w4 (1,32) against K=32 of h (tb,32) -> (1, tb).
    # The batch ends up on the lane axis, so the store is an unmasked lane-dense vst
    # and the HBM writeback is 4 B/row (the wrapper reshapes (1,B)->(B,1) for free).
    o = jax.lax.dot_general(
        w4_ref[...], h.astype(jnp.bfloat16),
        dimension_numbers=(((1,), (1,)), ((), ())),
        preferred_element_type=jnp.float32) + b4_ref[...]
    o_ref[...] = o


def mlp_forward(x, folded, *, block_batch=8192):
    """x: (B, input_size) float32. folded: dict from fold_params(). Returns (B, 1) f32."""
    B, fin = x.shape

    # Batch tile: multiple of 128 (lane-packed output), capped at block_batch.
    tb = _round_up(min(block_batch, _round_up(B, 128)), 128)
    n_blocks = pl.cdiv(B, tb)
    if n_blocks < 2 and B > 128:
        # Keep >= 2 grid steps when the batch allows it so v7x's 2nd TensorCore is used.
        tb = _round_up(-(-B // 2), 128)
        n_blocks = pl.cdiv(B, tb)
    b_total = n_blocks * tb  # output padded to whole blocks (allocated by pallas_call)

    w1, b1 = folded["w1"], folded["b1"]
    w2, b2 = folded["w2"], folded["b2"]
    w3, b3 = folded["w3"], folded["b3"]
    w4, b4 = folded["w4"], folded["b4"]
    f1, f2, f3 = w1.shape[1], w2.shape[1], w3.shape[1]
    params = (w1, b1, w2, b2, w3, b3, w4, b4)

    def resident(a):
        # Full-array block with a constant index map: stays VMEM-resident across steps.
        return pl.BlockSpec(a.shape, lambda i: (0, 0))

    in_specs = [pl.BlockSpec((tb, fin), lambda i: (i, 0))] + [resident(a) for a in params]
    out_specs = pl.BlockSpec((1, tb), lambda i: (0, i))

    flops = 2 * B * (fin * f1 + f1 * f2 + f2 * f3 + f3 * 1)
    bytes_accessed = (B * fin * 4                                           # x (f32)
                      + sum(int(a.size) * a.dtype.itemsize for a in params)  # weights/biases
                      + b_total * 4)                                         # packed output

    out = pl.pallas_call(
        mlp_kernel,
        out_shape=jax.ShapeDtypeStruct((1, b_total), jnp.float32),
        grid=(n_blocks,),
        in_specs=in_specs,
        out_specs=out_specs,
        compiler_params=pltpu.CompilerParams(dimension_semantics=("parallel",)),
        cost_estimate=pl.CostEstimate(flops=flops, transcendentals=0,
                                      bytes_accessed=bytes_accessed),
    )(x, *params)

    # (1, b_total) -> (b_total, 1) is a free row-major reshape; drop block padding.
    return out.reshape(-1, 1)[:B]


def init_torch_params(key, input_size):
    """Deterministic synthetic parameters matching the PyTorch module shapes.

    Linear weights are stored transposed as (in, out) so the kernel computes x @ W.
    BatchNorm1d params (gamma, beta, running_mean, running_var) are kept separate here
    and folded by fold_params()."""
    dims = [(input_size, 128), (128, 64), (64, 32), (32, 1)]
    keys = jax.random.split(key, 16)
    raw = {}
    ki = 0
    for li, (fi, fo) in enumerate(dims, start=1):
        bound = 1.0 / float(fi) ** 0.5
        raw[f"w{li}"] = jax.random.uniform(keys[ki], (fi, fo), jnp.float32, -bound, bound); ki += 1
        raw[f"b{li}"] = jax.random.uniform(keys[ki], (fo,), jnp.float32, -bound, bound); ki += 1
        if li < 4:  # bn1 / bn2 / bn3
            raw[f"gamma{li}"] = 1.0 + 0.1 * jax.random.normal(keys[ki], (fo,), jnp.float32); ki += 1
            raw[f"beta{li}"] = 0.1 * jax.random.normal(keys[ki], (fo,), jnp.float32); ki += 1
            raw[f"mean{li}"] = 0.05 * jnp.arange(fo, dtype=jnp.float32)
            raw[f"var{li}"] = 1.0 + 0.01 * jnp.arange(fo, dtype=jnp.float32)
    return raw


def fold_params(raw, eps=1e-5):
    """Fold eval-mode BatchNorm into the Linear layers (in f32, cast afterwards):
         scale = gamma / sqrt(var + eps);  w' = w * scale;  b' = b * scale + (beta - mean*scale)
    Matmul weights (w1..w4) are bf16 MXU operands; biases stay f32."""
    folded = {}
    for li in (1, 2, 3):
        w = raw[f"w{li}"]
        b = raw[f"b{li}"]
        scale = raw[f"gamma{li}"] / jnp.sqrt(raw[f"var{li}"] + eps)
        shift = raw[f"beta{li}"] - raw[f"mean{li}"] * scale
        folded[f"w{li}"] = (w * scale[None, :]).astype(jnp.bfloat16)
        folded[f"b{li}"] = (b * scale + shift).reshape(1, -1).astype(jnp.float32)
    folded["w4"] = raw["w4"].reshape(1, -1).astype(jnp.bfloat16)   # (32,1) -> (1,32) row
    folded["b4"] = raw["b4"].reshape(1, 1).astype(jnp.float32)
    return folded


def _reference_folded(x, folded):
    """Pure-JAX reference following the exact math path of the kernel (bf16 matmuls)."""
    def lrelu(v):
        return jnp.where(v > 0, v, 0.01 * v)
    h = x.astype(jnp.bfloat16)
    h = lrelu(jnp.dot(h, folded["w1"], preferred_element_type=jnp.float32) + folded["b1"])
    h = lrelu(jnp.dot(h.astype(jnp.bfloat16), folded["w2"],
                      preferred_element_type=jnp.float32) + folded["b2"])
    h = lrelu(jnp.dot(h.astype(jnp.bfloat16), folded["w3"],
                      preferred_element_type=jnp.float32) + folded["b3"])
    o = jax.lax.dot_general(folded["w4"], h.astype(jnp.bfloat16),
                            dimension_numbers=(((1,), (1,)), ((), ())),
                            preferred_element_type=jnp.float32) + folded["b4"]
    return o.reshape(-1, 1)


def _reference_module_f32(x, raw, eps=1e-5):
    """Full-precision, unfolded reference matching the original PyTorch module (eval mode)."""
    def lrelu(v):
        return jnp.where(v > 0, v, 0.01 * v)

    def bn(h, li):
        scale = raw[f"gamma{li}"] / jnp.sqrt(raw[f"var{li}"] + eps)
        return (h - raw[f"mean{li}"]) * scale + raw[f"beta{li}"]

    h = lrelu(bn(x @ raw["w1"] + raw["b1"], 1))
    h = lrelu(bn(h @ raw["w2"] + raw["b2"], 2))
    h = lrelu(bn(h @ raw["w3"] + raw["b3"], 3))
    return h @ raw["w4"] + raw["b4"]


if __name__ == "__main__":
    key = jax.random.PRNGKey(0)
    k_param, k_x, k_x2 = jax.random.split(key, 3)

    batch = 8
    input_size = 32
    raw = init_torch_params(k_param, input_size)
    folded = fold_params(raw)
    x = jax.random.normal(k_x, (batch, input_size), jnp.float32)

    out = mlp_forward(x, folded)
    jax.block_until_ready(out)
    assert out.shape == (batch, 1)

    # Exact-path check (same bf16-matmul / f32-accumulate math as the kernel).
    ref_exact = _reference_folded(x, folded)
    assert jnp.allclose(out, ref_exact, atol=5e-3, rtol=5e-3)

    # Semantic check against the original module in full f32 (loose tolerance for bf16 matmuls).
    ref_module = _reference_module_f32(x, raw)
    assert jnp.allclose(out, ref_module, atol=1e-1, rtol=1e-1)

    # Multi-block grid + ragged tail (no wrapper-side jnp.pad; Pallas clips the last block).
    batch2 = 300
    x2 = jax.random.normal(k_x2, (batch2, input_size), jnp.float32)
    out2 = mlp_forward(x2, folded)
    jax.block_until_ready(out2)
    assert out2.shape == (batch2, 1)
    assert jnp.allclose(out2, _reference_folded(x2, folded), atol=5e-3, rtol=5e-3)

    # TODO(synk): Dropout(p=0.2) is treated as identity (eval mode); no train-mode RNG dropout.
    print("KERNEL_OK")
</pallas_src>

<mosaic_0001>
module attributes {stable_mosaic.version = 11 : i64} {
  func.func @mlp_kernel(%arg0: i32, %arg1: memref<128x32xf32, #tpu.memory_space<vmem>>, %arg2: memref<32x128xbf16, #tpu.memory_space<vmem>>, %arg3: memref<1x128xf32, #tpu.memory_space<vmem>>, %arg4: memref<128x64xbf16, #tpu.memory_space<vmem>>, %arg5: memref<1x64xf32, #tpu.memory_space<vmem>>, %arg6: memref<64x32xbf16, #tpu.memory_space<vmem>>, %arg7: memref<1x32xf32, #tpu.memory_space<vmem>>, %arg8: memref<1x32xbf16, #tpu.memory_space<vmem>>, %arg9: memref<1x1xf32, #tpu.memory_space<vmem>>, %arg10: memref<1x128xf32, #tpu.memory_space<vmem>>) attributes {dimension_semantics = [#tpu.dimension_semantics<parallel>], iteration_bounds = array<i64: 1>, scalar_prefetch = 0 : i64, scratch_operands = 0 : i64, tpu.core_type = #tpu.core_type<tc>, window_params = [{transform_indices = @transform_0, window_bounds = array<i64: 128, 32>}, {pipeline_mode = #tpu.pipeline_mode<synchronous>, transform_indices = @transform_1, window_bounds = array<i64: 32, 128>}, {pipeline_mode = #tpu.pipeline_mode<synchronous>, transform_indices = @transform_2, window_bounds = array<i64: 1, 128>}, {pipeline_mode = #tpu.pipeline_mode<synchronous>, transform_indices = @transform_3, window_bounds = array<i64: 128, 64>}, {pipeline_mode = #tpu.pipeline_mode<synchronous>, transform_indices = @transform_4, window_bounds = array<i64: 1, 64>}, {pipeline_mode = #tpu.pipeline_mode<synchronous>, transform_indices = @transform_5, window_bounds = array<i64: 64, 32>}, {pipeline_mode = #tpu.pipeline_mode<synchronous>, transform_indices = @transform_6, window_bounds = array<i64: 1, 32>}, {pipeline_mode = #tpu.pipeline_mode<synchronous>, transform_indices = @transform_7, window_bounds = array<i64: 1, 32>}, {pipeline_mode = #tpu.pipeline_mode<synchronous>, transform_indices = @transform_8, window_bounds = array<i64: 1, 1>}, {transform_indices = @transform_9, window_bounds = array<i64: 1, 128>}]} {
    %c0 = arith.constant 0 : index
    %c0_0 = arith.constant 0 : index
    %0 = vector.load %arg1[%c0, %c0_0] : memref<128x32xf32, #tpu.memory_space<vmem>>, vector<128x32xf32>
    %1 = arith.truncf %0 : vector<128x32xf32> to vector<128x32xbf16>
    %c0_1 = arith.constant 0 : index
    %c0_2 = arith.constant 0 : index
    %2 = vector.load %arg2[%c0_1, %c0_2] : memref<32x128xbf16, #tpu.memory_space<vmem>>, vector<32x128xbf16>
    %cst = arith.constant dense<0.000000e+00> : vector<128x128xf32>
    %3 = tpu.matmul %1, %2, %cst {dimension_numbers = #tpu.dot_dimension_numbers<[1], [0], [0], [1], [0, 0, 1, 1], [], []>} : vector<128x32xbf16>, vector<32x128xbf16>, vector<128x128xf32> -> vector<128x128xf32>
    %c0_3 = arith.constant 0 : index
    %c0_4 = arith.constant 0 : index
    %4 = vector.load %arg3[%c0_3, %c0_4] : memref<1x128xf32, #tpu.memory_space<vmem>>, vector<1x128xf32>
    %5 = vector.broadcast %4 : vector<1x128xf32> to vector<128x128xf32>
    %6 = arith.addf %3, %5 : vector<128x128xf32>
    %cst_5 = arith.constant 0.000000e+00 : f32
    %7 = vector.broadcast %cst_5 : f32 to vector<128x128xf32>
    %8 = arith.cmpf ogt, %6, %7 : vector<128x128xf32>
    %cst_6 = arith.constant 0.00999999977 : f32
    %9 = vector.broadcast %cst_6 : f32 to vector<128x128xf32>
    %10 = arith.mulf %9, %6 : vector<128x128xf32>
    %11 = arith.select %8, %6, %10 : vector<128x128xi1>, vector<128x128xf32>
    %12 = arith.truncf %11 : vector<128x128xf32> to vector<128x128xbf16>
    %c0_7 = arith.constant 0 : index
    %c0_8 = arith.constant 0 : index
    %13 = vector.load %arg4[%c0_7, %c0_8] : memref<128x64xbf16, #tpu.memory_space<vmem>>, vector<128x64xbf16>
    %cst_9 = arith.constant dense<0.000000e+00> : vector<128x64xf32>
    %14 = tpu.matmul %12, %13, %cst_9 {dimension_numbers = #tpu.dot_dimension_numbers<[1], [0], [0], [1], [0, 0, 1, 1], [], []>} : vector<128x128xbf16>, vector<128x64xbf16>, vector<128x64xf32> -> vector<128x64xf32>
    %c0_10 = arith.constant 0 : index
    %c0_11 = arith.constant 0 : index
    %15 = vector.load %arg5[%c0_10, %c0_11] : memref<1x64xf32, #tpu.memory_space<vmem>>, vector<1x64xf32>
    %16 = vector.broadcast %15 : vector<1x64xf32> to vector<128x64xf32>
    %17 = arith.addf %14, %16 : vector<128x64xf32>
    %cst_12 = arith.constant 0.000000e+00 : f32
    %18 = vector.broadcast %cst_12 : f32 to vector<128x64xf32>
    %19 = arith.cmpf ogt, %17, %18 : vector<128x64xf32>
    %cst_13 = arith.constant 0.00999999977 : f32
    %20 = vector.broadcast %cst_13 : f32 to vector<128x64xf32>
    %21 = arith.mulf %20, %17 : vector<128x64xf32>
    %22 = arith.select %19, %17, %21 : vector<128x64xi1>, vector<128x64xf32>
    %23 = arith.truncf %22 : vector<128x64xf32> to vector<128x64xbf16>
    %c0_14 = arith.constant 0 : index
    %c0_15 = arith.constant 0 : index
    %24 = vector.load %arg6[%c0_14, %c0_15] : memref<64x32xbf16, #tpu.memory_space<vmem>>, vector<64x32xbf16>
    %cst_16 = arith.constant dense<0.000000e+00> : vector<128x32xf32>
    %25 = tpu.matmul %23, %24, %cst_16 {dimension_numbers = #tpu.dot_dimension_numbers<[1], [0], [0], [1], [0, 0, 1, 1], [], []>} : vector<128x64xbf16>, vector<64x32xbf16>, vector<128x32xf32> -> vector<128x32xf32>
    %c0_17 = arith.constant 0 : index
    %c0_18 = arith.constant 0 : index
    %26 = vector.load %arg7[%c0_17, %c0_18] : memref<1x32xf32, #tpu.memory_space<vmem>>, vector<1x32xf32>
    %27 = vector.broadcast %26 : vector<1x32xf32> to vector<128x32xf32>
    %28 = arith.addf %25, %27 : vector<128x32xf32>
    %cst_19 = arith.constant 0.000000e+00 : f32
    %29 = vector.broadcast %cst_19 : f32 to vector<128x32xf32>
    %30 = arith.cmpf ogt, %28, %29 : vector<128x32xf32>
    %cst_20 = arith.constant 0.00999999977 : f32
    %31 = vector.broadcast %cst_20 : f32 to vector<128x32xf32>
    %32 = arith.mulf %31, %28 : vector<128x32xf32>
    %33 = arith.select %30, %28, %32 : vector<128x32xi1>, vector<128x32xf32>
    %c0_21 = arith.constant 0 : index
    %c0_22 = arith.constant 0 : index
    %34 = vector.load %arg8[%c0_21, %c0_22] : memref<1x32xbf16, #tpu.memory_space<vmem>>, vector<1x32xbf16>
    %35 = arith.truncf %33 : vector<128x32xf32> to vector<128x32xbf16>
    %cst_23 = arith.constant dense<0.000000e+00> : vector<1x128xf32>
    %36 = tpu.matmul %34, %35, %cst_23 {dimension_numbers = #tpu.dot_dimension_numbers<[1], [1], [0], [0], [0, 0, 1, 0], [], []>} : vector<1x32xbf16>, vector<128x32xbf16>, vector<1x128xf32> -> vector<1x128xf32>
    %c0_24 = arith.constant 0 : index
    %c0_25 = arith.constant 0 : index
    %37 = vector.load %arg9[%c0_24, %c0_25] : memref<1x1xf32, #tpu.memory_space<vmem>>, vector<1x1xf32>
    %38 = vector.broadcast %37 : vector<1x1xf32> to vector<1x128xf32>
    %39 = arith.addf %36, %38 : vector<1x128xf32>
    %c0_26 = arith.constant 0 : index
    %c0_27 = arith.constant 0 : index
    %40 = vector.load %arg10[%c0_26, %c0_27] : memref<1x128xf32, #tpu.memory_space<vmem>>, vector<1x128xf32>
    tpu.vector_store %arg10[%c0_26, %c0_27], %39 {strides = array<i32>} : memref<1x128xf32, #tpu.memory_space<vmem>>, vector<1x128xf32>,
    return
  }
  func.func @transform_0(%arg0: i32) -> (i32, i32) {
    %c0_i32 = arith.constant 0 : i32
    %c0_i32_0 = arith.constant 0 : i32
    return %arg0, %c0_i32 : i32, i32
  }
  func.func @transform_1(%arg0: i32) -> (i32, i32) {
    %c0_i32 = arith.constant 0 : i32
    %c0_i32_0 = arith.constant 0 : i32
    %c0_i32_1 = arith.constant 0 : i32
    return %c0_i32, %c0_i32_0 : i32, i32
  }
  func.func @transform_2(%arg0: i32) -> (i32, i32) {
    %c0_i32 = arith.constant 0 : i32
    %c0_i32_0 = arith.constant 0 : i32
    %c0_i32_1 = arith.constant 0 : i32
    return %c0_i32, %c0_i32_0 : i32, i32
  }
  func.func @transform_3(%arg0: i32) -> (i32, i32) {
    %c0_i32 = arith.constant 0 : i32
    %c0_i32_0 = arith.constant 0 : i32
    %c0_i32_1 = arith.constant 0 : i32
    return %c0_i32, %c0_i32_0 : i32, i32
  }
  func.func @transform_4(%arg0: i32) -> (i32, i32) {
    %c0_i32 = arith.constant 0 : i32
    %c0_i32_0 = arith.constant 0 : i32
    %c0_i32_1 = arith.constant 0 : i32
    return %c0_i32, %c0_i32_0 : i32, i32
  }
  func.func @transform_5(%arg0: i32) -> (i32, i32) {
    %c0_i32 = arith.constant 0 : i32
    %c0_i32_0 = arith.constant 0 : i32
    %c0_i32_1 = arith.constant 0 : i32
    return %c0_i32, %c0_i32_0 : i32, i32
  }
  func.func @transform_6(%arg0: i32) -> (i32, i32) {
    %c0_i32 = arith.constant 0 : i32
    %c0_i32_0 = arith.constant 0 : i32
    %c0_i32_1 = arith.constant 0 : i32
    return %c0_i32, %c0_i32_0 : i32, i32
  }
  func.func @transform_7(%arg0: i32) -> (i32, i32) {
    %c0_i32 = arith.constant 0 : i32
    %c0_i32_0 = arith.constant 0 : i32
    %c0_i32_1 = arith.constant 0 : i32
    return %c0_i32, %c0_i32_0 : i32, i32
  }
  func.func @transform_8(%arg0: i32) -> (i32, i32) {
    %c0_i32 = arith.constant 0 : i32
    %c0_i32_0 = arith.constant 0 : i32
    %c0_i32_1 = arith.constant 0 : i32
    return %c0_i32, %c0_i32_0 : i32, i32
  }
  func.func @transform_9(%arg0: i32) -> (i32, i32) {
    %c0_i32 = arith.constant 0 : i32
    %c0_i32_0 = arith.constant 0 : i32
    return %c0_i32, %arg0 : i32, i32
  }
}

</mosaic_0001>

<bundles_post_ra>
// kernel: tpu_custom_call.1
= control target key start
LH: loop header
LB: loop body
LE: loop exit
PB: predicated region body
PF: predicated region fallthrough
CT: control target
= control target key end

     0   :  { %s1290_s0 = inlined_call_operand.vmem [shape: f32[8,32], index: 0, kind: input, shape index: {}]   ;;  %s1291_s1 = inlined_call_operand.vmem [shape: bf16[32,128], index: 1, kind: input, shape index: {}]   ;;  %s1292_s2 = inlined_call_operand.vmem [shape: f32[1,128], index: 2, kind: input, shape index: {}]   ;;  %s1293_s3 = inlined_call_operand.vmem [shape: bf16[128,64], index: 3, kind: input, shape index: {}]   ;;  %s1294_s4 = inlined_call_operand.vmem [shape: f32[1,64], index: 4, kind: input, shape index: {}]   ;;  %s1295_s5 = inlined_call_operand.vmem [shape: bf16[64,32], index: 5, kind: input, shape index: {}]   ;;  %s1296_s6 = inlined_call_operand.vmem [shape: f32[1,32], index: 6, kind: input, shape index: {}]   ;;  %s1297_s7 = inlined_call_operand.vmem [shape: bf16[1,32], index: 7, kind: input, shape index: {}]   ;;  %s1298_s8 = inlined_call_operand.<no memory space> [shape: f32[1,1], index: 8, kind: input, shape index: {}]   ;;  %s1299_s9 = inlined_call_operand.hbm [shape: f32[1,128], index: 9, kind: output, shape index: {}]  }
   0x1   :  { %v14_v0 = vstv %s1298_s8 }
   0x2   :  { %15 = vst [vmem:[#allocation2] sm:$0x1] %v14_v0 }
   0x3   :  { %v977_v1 = vld [vmem:[%s1291_s1 + $0x8] sm:$0xff]   ;;  %v978_v2 = vld [vmem:[%s1291_s1] sm:$0xff]   ;;  %vm83_vm0 = vcmask 261120   ;;  %v38_v6 = vld [vmem:[%s1290_s0 + $0x10] sm:$0xff] }
   0x4   :  { %876 = vmatprep.subr.bf16.mxu0 %v977_v1  ;;  %v36_v3 = vld [vmem:[%s1290_s0] sm:$0xff]  ;;  %v37_v4 = vld [vmem:[%s1290_s0 + $0x8] sm:$0xff]  ;;  %v39_v7 = vld [vmem:[%s1290_s0 + $0x18] sm:$0xff] }
   0x5   :  { %877 = vmatpush3.bf16.msra.mxu0 %v977_v1  ;;  %v52_v5 = vpack.c.bf16 %v37_v4, %v36_v3  ;;  %v40_v8 = vld [vmem:[%s1290_s0 + $0x20] sm:$0xff]  ;;  %v41_v9 = vld [vmem:[%s1290_s0 + $0x28] sm:$0xff]  ;;  %v53_v10 = vpack.c.bf16 %v39_v7, %v38_v6  ;;  %v979_v12 = vld [vmem:[%s1293_s3 + $0x38] sm:$0xff]  }
   0x6   :  { %878 = vmatprep.subr.bf16.mxu0 %v978_v2  ;;  %v54_v11 = vpack.c.bf16 %v41_v9, %v40_v8  ;;  %v42_v13 = vld [vmem:[%s1290_s0 + $0x30] sm:$0xff]  ;;  %v43_v14 = vld [vmem:[%s1290_s0 + $0x38] sm:$0xff]  ;;  %v44_v16 = vld [vmem:[%s1290_s0 + $0x40] sm:$0xff]  ;;  %896 = vmatprep.subr.bf16.mxu1 %v979_v12 }
   0x7   :  { %880 = vmatprep.mubr.msk.bf16.mxu0 %vm83_vm0, %v52_v5  ;;  %v980_v15 = vld [vmem:[%s1293_s3 + $0x30] sm:$0xff]   ;;  %v45_v17 = vld [vmem:[%s1290_s0 + $0x48] sm:$0xff]  ;;  %897 = vmatpush3.bf16.msra.mxu1 %v979_v12  ;;  %v55_v19 = vpack.c.bf16 %v43_v14, %v42_v13  ;;  %v982_v20 = vld [vmem:[%s1293_s3 + $0x20] sm:$0xff]  }
   0x8   :  { %898 = vmatprep.subr.bf16.mxu1 %v980_v15  ;;  %v981_v18 = vld [vmem:[%s1293_s3 + $0x28] sm:$0xff]   ;;  %v56_v21 = vpack.c.bf16 %v45_v17, %v44_v16 }
   0x9   :  { %879 = vmatpush3.bf16.msra.mxu0 %v978_v2 }
   0xb   :  { %899 = vmatpush3.bf16.msra.mxu1 %v980_v15 }
   0xc   :  { %881 = vmatmul.mubr.msk.bf16.vlgmr.msra.gmra.mxu0 %vm83_vm0, %v53_v10  ;;  %900 = vmatprep.subr.bf16.mxu1 %v981_v18 }
   0xd   :  { %884 = vmatprep.mubr.msk.bf16.mxu0 %vm83_vm0, %v54_v11 }
   0xe   :  { %16 = vsyncpa [#allocation4], 0  ;;  %v46_v22 = vld [vmem:[%s1290_s0 + $0x50] sm:$0xff]  ;;  %v47_v23 = vld [vmem:[%s1290_s0 + $0x58] sm:$0xff]  ;;  %s1016_s25 = smov [#allocation3]  }
   0xf   :  { %901 = vmatpush3.bf16.msra.mxu1 %v981_v18  ;;  %v48_v24 = vld [vmem:[%s1290_s0 + $0x60] sm:$0xff]  ;;  %v49_v25 = vld [vmem:[%s1290_s0 + $0x68] sm:$0xff]  ;;  %v983_v26 = vld [vmem:[%s1293_s3 + $0x18] sm:$0xff]   ;;  %v57_v27 = vpack.c.bf16 %v47_v23, %v46_v22  ;;  %s787_s26 = sshll.u32 %s1016_s25, 4  ;;  %s788_s26 = int_to_ptr.vmem [resolvable:$true] %s787_s26 }
  0x10   :  { %902 = vmatprep.subr.bf16.mxu1 %v982_v20  ;;  %v58_v28 = vpack.c.bf16 %v49_v25, %v48_v24  ;;  %v50_v29 = vld [vmem:[%s1290_s0 + $0x70] sm:$0xff]  ;;  %v51_v30 = vld [vmem:[%s1290_s0 + $0x78] sm:$0xff]  ;;  %v985_v33 = vld [vmem:[%s1293_s3 + $0x8] sm:$0xff]   ;;  %s991_s27 = scalar_lea.vmem %s788_s26, 16  ;;  %s995_s28 = scalar_lea.vmem %s788_s26, 32 }
  0x11   :  { %v59_v31 = vpack.c.bf16 %v51_v30, %v50_v29  ;;  %v984_v32 = vld [vmem:[%s1293_s3 + $0x10] sm:$0xff]   ;;  %v986_v34 = vld [vmem:[%s1293_s3] sm:$0xff]   ;;  %v987_v35 = vld [vmem:[%s1295_s5 + $0x18] sm:$0xff]   ;;  %p992_p0 = scmp.ne.s32.totalorder %s788_s26, %s991_s27  ;;  %p996_p1 = scmp.lt.s32.totalorder %s788_s26, %s788_s26 }
  0x12   :  { %v988_v36 = vld [vmem:[%s1295_s5 + $0x10] sm:$0xff]   ;;  %928 = vmatprep.subr.bf16.mxu0 %v987_v35  ;;  %v989_v37 = vld [vmem:[%s1295_s5 + $0x8] sm:$0xff]   ;;  %v1168_v39 = vld [vmem:[%s1292_s2] ss:$0 sm:$0xff]  ;;  %p997_p2 = scmp.lt.s32.totalorder %s995_s28, %s991_s27 }
  0x13   :  { %903 = vmatpush3.bf16.msra.mxu1 %v982_v20  ;;  %929 = vmatpush3.bf16.msra.mxu0 %v987_v35 }
  0x14   :  { %885 = vmatmul.mubr.msk.bf16.gmra.mxu0 %vm83_vm0, %v55_v19  ;;  %904 = vmatprep.subr.bf16.mxu1 %v983_v26  ;;  %p998_p3 = por %p997_p2, %p996_p1 }
  0x15   :  { %888 = vmatprep.mubr.msk.bf16.mxu0 %vm83_vm0, %v56_v21  ;;  %930 = vmatprep.subr.bf16.mxu0 %v988_v36 }
  0x16   :  { %p999_p4 = pnand %p998_p3, %p992_p0 }
  0x17   :  { %905 = vmatpush3.bf16.msra.mxu1 %v983_v26  ;;  %931 = vmatpush3.bf16.msra.mxu0 %v988_v36 }
  0x18   :  { %906 = vmatprep.subr.bf16.mxu1 %v984_v32  ;;  %932 = vmatprep.subr.bf16.mxu0 %v989_v37 }
  0x1b   :  { %907 = vmatpush3.bf16.msra.mxu1 %v984_v32  ;;  %933 = vmatpush3.bf16.msra.mxu0 %v989_v37 }
  0x1c   :  { %889 = vmatmul.mubr.msk.bf16.gmra.mxu0 %vm83_vm0, %v57_v27  ;;  %908 = vmatprep.subr.bf16.mxu1 %v985_v33 }
  0x1d   :  { %892 = vmatprep.mubr.msk.bf16.mxu0 %vm83_vm0, %v58_v28 }
  0x1f   :  { %909 = vmatpush3.bf16.msra.mxu1 %v985_v33 }
  0x20   :  { %910 = vmatprep.subr.bf16.mxu1 %v986_v34 }
  0x23   :  { %911 = vmatpush3.bf16.msra.mxu1 %v986_v34 }
  0x24   :  { %893 = vmatmul.mubr.msk.bf16.gmra.mxu0 %vm83_vm0, %v59_v31 }
  0xcc   :  { %v882_v38 = vpop.f32.mrf.mxu0 }
  0xcd   :  { %v151_v42 = vadd.f32 %v882_v38, %v1168_v39 }
  0xce   :  { %v142_v40 = vpop.f32.mrf.mxu0 }
  0xcf   :  { %v143_v41 = vadd.f32 %v1168_v39, %v142_v40  ;;  %v223_v49 = vmul.f32 0.01, %v151_v42  ;;  %vm207_vm3 = vcmp.gt.f32.partialorder %v151_v42, 0.0 }
  0xd0   :  { %v883_v43 = vpop.f32.mrf.mxu0 }
  0xd1   :  { %v154_v44 = vadd.f32 %v883_v43, %v1168_v39  ;;  %v221_v46 = vmul.f32 0.01, %v143_v41  ;;  %vm205_vm2 = vcmp.gt.f32.partialorder %v143_v41, 0.0  ;;  %v239_v60 = vsel %vm207_vm3, %v151_v42, %v223_v49  ;;  %v1192_v49 = vld [vmem:[%s1294_s4] ss:$0 sm:$0xff] }
  0xd2   :  { %v145_v45 = vpop.f32.mrf.mxu0 }
  0xd3   :  { %vm208_vm1 = vcmp.gt.f32.partialorder %v154_v44, 0.0  ;;  %v224_v47 = vmul.f32 0.01, %v154_v44  ;;  %v146_v48 = vadd.f32 %v1168_v39, %v145_v45  ;;  %v237_v55 = vsel %vm205_vm2, %v143_v41, %v221_v46 }
  0xd4   :  { %v886_v50 = vpop.f32.mrf.mxu0 }
  0xd5   :  { %v222_v51 = vmul.f32 0.01, %v146_v48  ;;  %vm206_vm4 = vcmp.gt.f32.partialorder %v146_v48, 0.0  ;;  %v240_v53 = vsel %vm208_vm1, %v154_v44, %v224_v47  ;;  %v167_v57 = vadd.f32 %v886_v50, %v1168_v39 }
  0xd6   :  { %v158_v52 = vpop.f32.mrf.mxu0  ;;  %v254_v62 = vpack.c.bf16 %v240_v53, %v239_v60 }
  0xd7   :  { %v159_v54 = vadd.f32 %v1168_v39, %v158_v52  ;;  %v238_v56 = vsel %vm206_vm4, %v146_v48, %v222_v51  ;;  %v227_v3 = vmul.f32 0.01, %v167_v57  ;;  %vm211_vm7 = vcmp.gt.f32.partialorder %v167_v57, 0.0  ;;  %v990_v48 = vld [vmem:[%s1295_s5] sm:$0xff]  }
  0xd8   :  { %v887_v58 = vpop.f32.mrf.mxu0  ;;  %v253_v59 = vpack.c.bf16 %v238_v56, %v237_v55  ;;  %934 = vmatprep.subr.bf16.mxu0 %v990_v48 }
  0xd9   :  { %v170_v61 = vadd.f32 %v887_v58, %v1168_v39  ;;  %v225_v0 = vmul.f32 0.01, %v159_v54  ;;  %vm209_vm6 = vcmp.gt.f32.partialorder %v159_v54, 0.0  ;;  %v243_v14 = vsel %vm211_vm7, %v167_v57, %v227_v3  ;;  %935 = vmatpush3.bf16.msra.mxu0 %v990_v48 }
  0xda   :  { %v161_v63 = vpop.f32.mrf.mxu0  ;;  %912 = vmatprep.mubr.bf16.mxu1 %v253_v59 }
  0xdb   :  { %vm212_vm5 = vcmp.gt.f32.partialorder %v170_v61, 0.0  ;;  %v228_v1 = vmul.f32 0.01, %v170_v61  ;;  %v162_v2 = vadd.f32 %v1168_v39, %v161_v63  ;;  %913 = vmatmul.mubr.bf16.vlgmr.msra.gmra.mxu1 %v254_v62  ;;  %v241_v9 = vsel %vm209_vm6, %v159_v54, %v225_v0 }
  0xdc   :  { %v890_v4 = vpop.f32.mrf.mxu0  ;;  %vm524_vm6 = vcmask 523264  }
  0xdd   :  { %vm210_vm8 = vcmp.gt.f32.partialorder %v162_v2, 0.0  ;;  %v226_v5 = vmul.f32 0.01, %v162_v2  ;;  %v244_v7 = vsel %vm212_vm5, %v170_v61, %v228_v1  ;;  %v183_v11 = vadd.f32 %v890_v4, %v1168_v39 }
  0xde   :  { %v174_v6 = vpop.f32.mrf.mxu0  ;;  %v256_v16 = vpack.c.bf16 %v244_v7, %v243_v14 }
  0xdf   :  { %v175_v8 = vadd.f32 %v1168_v39, %v174_v6  ;;  %v242_v10 = vsel %vm210_vm8, %v162_v2, %v226_v5  ;;  %v231_v21 = vmul.f32 0.01, %v183_v11  ;;  %vm215_vm11 = vcmp.gt.f32.partialorder %v183_v11, 0.0 }
  0xe0   :  { %v891_v12 = vpop.f32.mrf.mxu0  ;;  %v255_v13 = vpack.c.bf16 %v242_v10, %v241_v9 }
  0xe1   :  { %v186_v15 = vadd.f32 %v891_v12, %v1168_v39  ;;  %v229_v18 = vmul.f32 0.01, %v175_v8  ;;  %vm213_vm10 = vcmp.gt.f32.partialorder %v175_v8, 0.0  ;;  %v247_v32 = vsel %vm215_vm11, %v183_v11, %v231_v21 }
  0xe2   :  { %v177_v17 = vpop.f32.mrf.mxu0  ;;  %916 = vmatprep.mubr.bf16.mxu1 %v255_v13 }
  0xe3   :  { %vm216_vm9 = vcmp.gt.f32.partialorder %v186_v15, 0.0  ;;  %v232_v19 = vmul.f32 0.01, %v186_v15  ;;  %v178_v20 = vadd.f32 %v1168_v39, %v177_v17  ;;  %917 = vmatmul.mubr.bf16.gmra.mxu1 %v256_v16  ;;  %v245_v27 = vsel %vm213_vm10, %v175_v8, %v229_v18 }
  0xe4   :  { %v894_v22 = vpop.f32.mrf.mxu0 }
  0xe5   :  { %vm214_vm12 = vcmp.gt.f32.partialorder %v178_v20, 0.0  ;;  %v230_v23 = vmul.f32 0.01, %v178_v20  ;;  %v248_v25 = vsel %vm216_vm9, %v186_v15, %v232_v19  ;;  %v199_v29 = vadd.f32 %v894_v22, %v1168_v39 }
  0xe6   :  { %v190_v24 = vpop.f32.mrf.mxu0  ;;  %v258_v34 = vpack.c.bf16 %v248_v25, %v247_v32 }
  0xe7   :  { %v191_v26 = vadd.f32 %v1168_v39, %v190_v24  ;;  %v246_v28 = vsel %vm214_vm12, %v178_v20, %v230_v23  ;;  %v235_v40 = vmul.f32 0.01, %v199_v29  ;;  %vm219_vm15 = vcmp.gt.f32.partialorder %v199_v29, 0.0 }
  0xe8   :  { %v895_v30 = vpop.f32.mrf.mxu0  ;;  %v257_v31 = vpack.c.bf16 %v246_v28, %v245_v27 }
  0xe9   :  { %v202_v33 = vadd.f32 %v895_v30, %v1168_v39  ;;  %v233_v36 = vmul.f32 0.01, %v191_v26  ;;  %vm217_vm14 = vcmp.gt.f32.partialorder %v191_v26, 0.0  ;;  %v251_v46 = vsel %vm219_vm15, %v199_v29, %v235_v40 }
  0xea   :  { %v193_v35 = vpop.f32.mrf.mxu0  ;;  %920 = vmatprep.mubr.bf16.mxu1 %v257_v31 }
  0xeb   :  { %vm220_vm13 = vcmp.gt.f32.partialorder %v202_v33, 0.0  ;;  %v236_v37 = vmul.f32 0.01, %v202_v33  ;;  %v194_v38 = vadd.f32 %v1168_v39, %v193_v35  ;;  %921 = vmatmul.mubr.bf16.gmra.mxu1 %v258_v34  ;;  %v249_v43 = vsel %vm217_vm14, %v191_v26, %v233_v36 }
  0xed   :  { %vm218_vm1 = vcmp.gt.f32.partialorder %v194_v38, 0.0  ;;  %v234_v41 = vmul.f32 0.01, %v194_v38  ;;  %v252_v42 = vsel %vm220_vm13, %v202_v33, %v236_v37 }
  0xee   :  { %v260_v47 = vpack.c.bf16 %v252_v42, %v251_v46 }
  0xef   :  { %v250_v44 = vsel %vm218_vm1, %v194_v38, %v234_v41 }
  0xf0   :  { %v259_v45 = vpack.c.bf16 %v250_v44, %v249_v43 }
  0xf2   :  { %924 = vmatprep.mubr.bf16.mxu1 %v259_v45 }
  0xf3   :  { %925 = vmatmul.mubr.bf16.gmra.mxu1 %v260_v47 }
 0x19b   :  { %v914_v39 = vpop.f32.mrf.mxu1 }
 0x19c   :  { %v375_v52 = vadd.f32 %v914_v39, %v1192_v49 }
 0x19d   :  { %v366_v50 = vpop.f32.mrf.mxu1 }
 0x19e   :  { %v367_v51 = vadd.f32 %v1192_v49, %v366_v50  ;;  %v447_v59 = vmul.f32 0.01, %v375_v52  ;;  %vm431_vm4 = vcmp.gt.f32.partialorder %v375_v52, 0.0 }
 0x19f   :  { %v915_v53 = vpop.f32.mrf.mxu1 }
 0x1a0   :  { %v378_v54 = vadd.f32 %v915_v53, %v1192_v49  ;;  %v445_v56 = vmul.f32 0.01, %v367_v51  ;;  %vm429_vm3 = vcmp.gt.f32.partialorder %v367_v51, 0.0  ;;  %v463_v3 = vsel %vm431_vm4, %v375_v52, %v447_v59 }
 0x1a1   :  { %v369_v55 = vpop.f32.mrf.mxu1  ;;  %vm1014_vm4 = vmmov 0   ;;  %v1015_v59 = vmov 0  }
 0x1a2   :  { %vm432_vm2 = vcmp.gt.f32.partialorder %v378_v54, 0.0  ;;  %v448_v57 = vmul.f32 0.01, %v378_v54  ;;  %v370_v58 = vadd.f32 %v1192_v49, %v369_v55  ;;  %v461_v0 = vsel %vm429_vm3, %v367_v51, %v445_v56  ;;  %976 = vset.pattern.permute.xlu0 %v1015_v59 }
 0x1a3   :  { %v918_v60 = vpop.f32.mrf.mxu1 }
 0x1a4   :  { %vm430_vm5 = vcmp.gt.f32.partialorder %v370_v58, 0.0  ;;  %v446_v61 = vmul.f32 0.01, %v370_v58  ;;  %v464_v62 = vsel %vm432_vm2, %v378_v54, %v448_v57  ;;  %v391_v5 = vadd.f32 %v918_v60, %v1192_v49  ;;  %v1223_v60 = vld [vmem:[%s1296_s6] ss:$0 sm:$0xff] }
 0x1a5   :  { %v382_v63 = vpop.f32.mrf.mxu1  ;;  %v478_v7 = vpack.c.bf16 %v464_v62, %v463_v3 }
 0x1a6   :  { %v462_v1 = vsel %vm430_vm5, %v370_v58, %v446_v61  ;;  %v383_v2 = vadd.f32 %v1192_v49, %v382_v63  ;;  %v451_v13 = vmul.f32 0.01, %v391_v5  ;;  %vm435_vm9 = vcmp.gt.f32.partialorder %v391_v5, 0.0 }
 0x1a7   :  { %v477_v4 = vpack.c.bf16 %v462_v1, %v461_v0  ;;  %v919_v6 = vpop.f32.mrf.mxu1  ;;  %v1013_v58 = vmov 0.0  }
 0x1a8   :  { %v394_v8 = vadd.f32 %v919_v6, %v1192_v49  ;;  %v449_v10 = vmul.f32 0.01, %v383_v2  ;;  %vm433_vm8 = vcmp.gt.f32.partialorder %v383_v2, 0.0  ;;  %v467_v21 = vsel %vm435_vm9, %v391_v5, %v451_v13  ;;  %952 = vmatprep.subr.bf16.mxu1 %v1013_v58  ;;  %968 = vmatprep.mubr.msk.bf16.mxu1 %vm1014_vm4, %v1013_v58 }
 0x1a9   :  { %v385_v9 = vpop.f32.mrf.mxu1  ;;  %936 = vmatprep.mubr.msk.bf16.mxu0 %vm524_vm6, %v477_v4 }
 0x1aa   :  { %vm436_vm7 = vcmp.gt.f32.partialorder %v394_v8, 0.0  ;;  %v452_v11 = vmul.f32 0.01, %v394_v8  ;;  %v386_v12 = vadd.f32 %v1192_v49, %v385_v9  ;;  %937 = vmatmul.mubr.msk.bf16.vlgmr.msra.gmra.mxu0 %vm524_vm6, %v478_v7  ;;  %v465_v18 = vsel %vm433_vm8, %v383_v2, %v449_v10 }
 0x1ab   :  { %v922_v14 = vpop.f32.mrf.mxu1 }
 0x1ac   :  { %vm434_vm10 = vcmp.gt.f32.partialorder %v386_v12, 0.0  ;;  %v450_v15 = vmul.f32 0.01, %v386_v12  ;;  %v468_v16 = vsel %vm436_vm7, %v394_v8, %v452_v11  ;;  %v407_v23 = vadd.f32 %v922_v14, %v1192_v49 }
 0x1ad   :  { %v398_v17 = vpop.f32.mrf.mxu1  ;;  %v480_v25 = vpack.c.bf16 %v468_v16, %v467_v21 }
 0x1ae   :  { %v466_v19 = vsel %vm434_vm10, %v386_v12, %v450_v15  ;;  %v399_v20 = vadd.f32 %v1192_v49, %v398_v17  ;;  %v455_v31 = vmul.f32 0.01, %v407_v23  ;;  %vm439_vm13 = vcmp.gt.f32.partialorder %v407_v23, 0.0 }
 0x1af   :  { %v479_v22 = vpack.c.bf16 %v466_v19, %v465_v18  ;;  %v923_v24 = vpop.f32.mrf.mxu1 }
 0x1b0   :  { %v410_v26 = vadd.f32 %v923_v24, %v1192_v49  ;;  %v453_v28 = vmul.f32 0.01, %v399_v20  ;;  %vm437_vm12 = vcmp.gt.f32.partialorder %v399_v20, 0.0  ;;  %v471_v40 = vsel %vm439_vm13, %v407_v23, %v455_v31 }
 0x1b1   :  { %v401_v27 = vpop.f32.mrf.mxu1  ;;  %940 = vmatprep.mubr.msk.bf16.mxu0 %vm524_vm6, %v479_v22 }
 0x1b2   :  { %vm440_vm11 = vcmp.gt.f32.partialorder %v410_v26, 0.0  ;;  %v456_v29 = vmul.f32 0.01, %v410_v26  ;;  %v402_v30 = vadd.f32 %v1192_v49, %v401_v27  ;;  %941 = vmatmul.mubr.msk.bf16.gmra.mxu0 %vm524_vm6, %v480_v25  ;;  %v469_v36 = vsel %vm437_vm12, %v399_v20, %v453_v28 }
 0x1b3   :  { %v926_v32 = vpop.f32.mrf.mxu1 }
 0x1b4   :  { %vm438_vm14 = vcmp.gt.f32.partialorder %v402_v30, 0.0  ;;  %v454_v33 = vmul.f32 0.01, %v402_v30  ;;  %v472_v34 = vsel %vm440_vm11, %v410_v26, %v456_v29  ;;  %v423_v42 = vadd.f32 %v926_v32, %v1192_v49 }
 0x1b5   :  { %v414_v35 = vpop.f32.mrf.mxu1  ;;  %v482_v44 = vpack.c.bf16 %v472_v34, %v471_v40 }
 0x1b6   :  { %v470_v37 = vsel %vm438_vm14, %v402_v30, %v454_v33  ;;  %v415_v38 = vadd.f32 %v1192_v49, %v414_v35  ;;  %v459_v50 = vmul.f32 0.01, %v423_v42  ;;  %vm443_vm2 = vcmp.gt.f32.partialorder %v423_v42, 0.0 }
 0x1b7   :  { %v481_v41 = vpack.c.bf16 %v470_v37, %v469_v36  ;;  %v927_v43 = vpop.f32.mrf.mxu1 }
 0x1b8   :  { %v426_v45 = vadd.f32 %v927_v43, %v1192_v49  ;;  %v457_v47 = vmul.f32 0.01, %v415_v38  ;;  %vm441_vm1 = vcmp.gt.f32.partialorder %v415_v38, 0.0  ;;  %v475_v55 = vsel %vm443_vm2, %v423_v42, %v459_v50 }
 0x1b9   :  { %v417_v46 = vpop.f32.mrf.mxu1  ;;  %944 = vmatprep.mubr.msk.bf16.mxu0 %vm524_vm6, %v481_v41 }
 0x1ba   :  { %vm444_vm15 = vcmp.gt.f32.partialorder %v426_v45, 0.0  ;;  %v460_v48 = vmul.f32 0.01, %v426_v45  ;;  %v418_v39 = vadd.f32 %v1192_v49, %v417_v46  ;;  %945 = vmatmul.mubr.msk.bf16.gmra.mxu0 %vm524_vm6, %v482_v44  ;;  %v473_v53 = vsel %vm441_vm1, %v415_v38, %v457_v47  ;;  %v703_v49 = vld [vmem:[#allocation2] sm:$0x1] }
 0x1bb   :  { %706 = vperm.xlu0 %976, %v703_v49  }
 0x1bc   :  { %vm442_vm3 = vcmp.gt.f32.partialorder %v418_v39, 0.0  ;;  %v458_v51 = vmul.f32 0.01, %v418_v39  ;;  %v476_v52 = vsel %vm444_vm15, %v426_v45, %v460_v48 }
 0x1bd   :  { %v484_v57 = vpack.c.bf16 %v476_v52, %v475_v55 }
 0x1be   :  { %v474_v54 = vsel %vm442_vm3, %v418_v39, %v458_v51 }
 0x1bf   :  { %v483_v56 = vpack.c.bf16 %v474_v54, %v473_v53 }
 0x1c1   :  { %948 = vmatprep.mubr.msk.bf16.mxu0 %vm524_vm6, %v483_v56 }
 0x1c2   :  { %949 = vmatmul.mubr.msk.bf16.gmra.mxu0 %vm524_vm6, %v484_v57 }
 0x26a   :  { %v938_v61 = vpop.f32.mrf.mxu0 }
 0x26b   :  { %v592_v62 = vadd.f32 %v938_v61, %v1223_v60 }
 0x26c   :  { %v583_v63 = vpop.f32.mrf.mxu0 }
 0x26d   :  { %v584_v0 = vadd.f32 %v1223_v60, %v583_v63  ;;  %v664_v2 = vmul.f32 0.01, %v592_v62  ;;  %vm648_vm5 = vcmp.gt.f32.partialorder %v592_v62, 0.0 }
 0x26e   :  { %v939_v1 = vpop.f32.mrf.mxu0 }
 0x26f   :  { %v595_v3 = vadd.f32 %v939_v1, %v1223_v60  ;;  %v662_v5 = vmul.f32 0.01, %v584_v0  ;;  %vm646_vm7 = vcmp.gt.f32.partialorder %v584_v0, 0.0  ;;  %v1231_v9 = vsel %vm648_vm5, %v592_v62, %v664_v2 }
 0x270   :  { %v586_v4 = vpop.f32.mrf.mxu0 }
 0x271   :  { %vm649_vm6 = vcmp.gt.f32.partialorder %v595_v3, 0.0  ;;  %v665_v6 = vmul.f32 0.01, %v595_v3  ;;  %v587_v7 = vadd.f32 %v1223_v60, %v586_v4  ;;  %v1239_v14 = vsel %vm646_vm7, %v584_v0, %v662_v5 }
 0x272   :  { %v1229_v8 = vpop.f32.mrf.mxu0 }
 0x273   :  { %v1233_v10 = vsel %vm649_vm6, %v595_v3, %v665_v6  ;;  %vm647_vm8 = vcmp.gt.f32.partialorder %v587_v7, 0.0  ;;  %v663_v11 = vmul.f32 0.01, %v587_v7  ;;  %v608_v49 = vadd.f32 %v1229_v8, %v1223_v60 }
 0x274   :  { %v1235_v12 = vpop.f32.mrf.mxu0  ;;  %v696_v13 = vpack.c.bf16 %v1233_v10, %v1231_v9  ;;  %v707_v10 = vpop.permute.xlu0 %706 }
 0x275   :  { %v1241_v15 = vsel %vm647_vm8, %v587_v7, %v663_v11  ;;  %v668_v63 = vmul.f32 0.01, %v608_v49  ;;  %vm652_vm3 = vcmp.gt.f32.partialorder %v608_v49, 0.0  ;;  %v600_v4 = vadd.f32 %v1223_v60, %v1235_v12 }
 0x276   :  { %v943_v16 = vpop.f32.mrf.mxu0  ;;  %v695_v17 = vpack.c.bf16 %v1241_v15, %v1239_v14 }
 0x277   :  { %v611_v56 = vadd.f32 %v943_v16, %v1223_v60  ;;  %v684_v3 = vsel %vm652_vm3, %v608_v49, %v668_v63  ;;  %v666_v7 = vmul.f32 0.01, %v600_v4  ;;  %vm650_vm5 = vcmp.gt.f32.partialorder %v600_v4, 0.0 }
 0x278   :  { %v1245_v18 = vpop.f32.mrf.mxu0  ;;  %v717_v12 = vsel %vm83_vm0, %v695_v17, 0 }
 0x279   :  { %v669_v62 = vmul.f32 0.01, %v611_v56  ;;  %vm653_vm2 = vcmp.gt.f32.partialorder %v611_v56, 0.0  ;;  %v603_v2 = vadd.f32 %v1223_v60, %v1245_v18  ;;  %v682_v16 = vsel %vm650_vm5, %v600_v4, %v666_v7 }
 0x27a   :  { %v946_v19 = vpop.f32.mrf.mxu0 }
 0x27b   :  { %v624_v42 = vadd.f32 %v946_v19, %v1223_v60  ;;  %v685_v1 = vsel %vm653_vm2, %v611_v56, %v669_v62  ;;  %v667_v6 = vmul.f32 0.01, %v603_v2  ;;  %vm651_vm4 = vcmp.gt.f32.partialorder %v603_v2, 0.0 }
 0x27c   :  { %v615_v20 = vpop.f32.mrf.mxu0  ;;  %v698_v5 = vpack.c.bf16 %v685_v1, %v684_v3 }
 0x27d   :  { %v672_v46 = vmul.f32 0.01, %v624_v42  ;;  %vm656_vm14 = vcmp.gt.f32.partialorder %v624_v42, 0.0  ;;  %v616_v51 = vadd.f32 %v1223_v60, %v615_v20  ;;  %v683_v11 = vsel %vm651_vm4, %v603_v2, %v667_v6  ;;  %v694_v20 = vld [vmem:[%s1297_s7] sm:$0x1] }
 0x27e   :  { %v947_v21 = vpop.f32.mrf.mxu0  ;;  %v726_v8 = vsel %vm83_vm0, %v698_v5, 0  ;;  %v697_v18 = vpack.c.bf16 %v683_v11, %v682_v16 }
 0x27f   :  { %v627_v40 = vadd.f32 %v947_v21, %v1223_v60  ;;  %v688_v50 = vsel %vm656_vm14, %v624_v42, %v672_v46  ;;  %v670_v54 = vmul.f32 0.01, %v616_v51  ;;  %vm654_vm1 = vcmp.gt.f32.partialorder %v616_v51, 0.0 }
 0x280   :  { %v618_v22 = vpop.f32.mrf.mxu0  ;;  %v723_v19 = vsel %vm83_vm0, %v697_v18, 0  ;;  %v709_v21 = vlaneseq }
 0x281   :  { %v673_v45 = vmul.f32 0.01, %v627_v40  ;;  %vm657_vm13 = vcmp.gt.f32.partialorder %v627_v40, 0.0  ;;  %v619_v39 = vadd.f32 %v1223_v60, %v618_v22  ;;  %v686_v59 = vsel %vm654_vm1, %v616_v51, %v670_v54 }
 0x282   :  { %v950_v23 = vpop.f32.mrf.mxu0  ;;  %v710_v22 = vshrl.u32 %v709_v21, 7 }
 0x283   :  { %v640_v24 = vadd.f32 %v950_v23, %v1223_v60  ;;  %v689_v48 = vsel %vm657_vm13, %v627_v40, %v673_v45  ;;  %v671_v53 = vmul.f32 0.01, %v619_v39  ;;  %vm655_vm15 = vcmp.gt.f32.partialorder %v619_v39, 0.0 }
 0x284   :  { %v631_v25 = vpop.f32.mrf.mxu0  ;;  %v700_v52 = vpack.c.bf16 %v689_v48, %v688_v50  ;;  %v711_v9 = vsub.s32 0, %v710_v22 }
 0x285   :  { %v676_v27 = vmul.f32 0.01, %v640_v24  ;;  %vm660_vm9 = vcmp.gt.f32.partialorder %v640_v24, 0.0  ;;  %v632_v30 = vadd.f32 %v1223_v60, %v631_v25  ;;  %v687_v57 = vsel %vm655_vm15, %v619_v39, %v671_v53 }
 0x286   :  { %v951_v26 = vpop.f32.mrf.mxu0  ;;  %v732_v55 = vsel %vm83_vm0, %v700_v52, 0  ;;  %v699_v61 = vpack.c.bf16 %v687_v57, %v686_v59 }
 0x287   :  { %v643_v28 = vadd.f32 %v951_v26, %v1223_v60  ;;  %v692_v33 = vsel %vm660_vm9, %v640_v24, %v676_v27  ;;  %v674_v37 = vmul.f32 0.01, %v632_v30  ;;  %vm658_vm12 = vcmp.gt.f32.partialorder %v632_v30, 0.0 }
 0x288   :  { %v634_v29 = vpop.f32.mrf.mxu0  ;;  %v729_v0 = vsel %vm83_vm0, %v699_v61, 0 }
 0x289   :  { %vm661_vm10 = vcmp.gt.f32.partialorder %v643_v28, 0.0  ;;  %v677_v31 = vmul.f32 0.01, %v643_v28  ;;  %v635_v32 = vadd.f32 %v1223_v60, %v634_v29  ;;  %v690_v43 = vsel %vm658_vm12, %v632_v30, %v674_v37 }
 0x28a   :  { %v720_v60 = vsel %vm83_vm0, %v696_v13, 0  ;;  %v712_v13 = vrot.slane %v707_v10, %v711_v9 }
 0x28b   :  { %v693_v34 = vsel %vm661_vm10, %v643_v28, %v677_v31  ;;  %v675_v35 = vmul.f32 0.01, %v635_v32  ;;  %vm659_vm11 = vcmp.gt.f32.partialorder %v635_v32, 0.0 }
 0x28c   :  { %v702_v36 = vpack.c.bf16 %v693_v34, %v692_v33 }
 0x28d   :  { %v691_v41 = vsel %vm659_vm11, %v635_v32, %v675_v35 }
 0x28e   :  { %v738_v38 = vsel %vm83_vm0, %v702_v36, 0  ;;  %v701_v44 = vpack.c.bf16 %v691_v41, %v690_v43 }
 0x28f   :  { %953 = vmatpush3.bf16.xpose.msra.mxu1 %v738_v38 }
 0x290   :  { %954 = vmatprep.subr.bf16.mxu1 %v1013_v58  ;;  %v735_v47 = vsel %vm83_vm0, %v701_v44, 0 }
 0x297   :  { %955 = vmatpush3.bf16.xpose.msra.mxu1 %v735_v47 }
 0x298   :  { %956 = vmatprep.subr.bf16.mxu1 %v1013_v58 }
 0x29f   :  { %957 = vmatpush3.bf16.xpose.msra.mxu1 %v732_v55 }
 0x2a0   :  { %958 = vmatprep.subr.bf16.mxu1 %v1013_v58 }
 0x2a7   :  { %959 = vmatpush3.bf16.xpose.msra.mxu1 %v729_v0 }
 0x2a8   :  { %960 = vmatprep.subr.bf16.mxu1 %v1013_v58 }
 0x2af   :  { %961 = vmatpush3.bf16.xpose.msra.mxu1 %v726_v8 }
 0x2b0   :  { %962 = vmatprep.subr.bf16.mxu1 %v1013_v58 }
 0x2b7   :  { %963 = vmatpush3.bf16.xpose.msra.mxu1 %v723_v19 }
 0x2b8   :  { %964 = vmatprep.subr.bf16.mxu1 %v1013_v58 }
 0x2bf   :  { %965 = vmatpush3.bf16.xpose.msra.mxu1 %v720_v60 }
 0x2c0   :  { %966 = vmatprep.subr.bf16.mxu1 %v1013_v58 }
 0x2c7   :  { %967 = vmatpush3.bf16.xpose.msra.mxu1 %v717_v12 }
 0x2ce   :  { %969 = vmatmul.mubr.msk.bf16.vlgmr.msra.gmra.mxu1 %vm83_vm0, %v694_v20 }
 0x38e   :  { %v774_v58 = vpop.f32.mrf.mxu1 }
 0x38f   :  { %v775_v23 = vadd.f32 %v774_v58, %v712_v13 }
 0x390   :  { %v970_v14 = vpop.f32.mrf.mxu1 }
 0x391   :  { %780 = vst [vmem:[#allocation3] sm:$0x1] %v775_v23 }
 0x392   :  { %v777_v15 = vpop.f32.mrf.mxu1 }
 0x393   :  { %1002 = shalt.err (!%p999_p4)
}
 0x394   :  { %790 = dma.vmem_to_hbm [thread:$0]  %s788_s26, 16, %s1299_s9, [#allocation4]   ;;  %v971_v17 = vpop.f32.mrf.mxu1 }
 0x395   :  { %1011 = dma.done.wait [#allocation4], 16  }
 0x396   :  { %1012 = vsyncadd [#allocation4], 4294967280 }
 0x397   :  { %794 = vsyncpa [#allocation4], 1 }

</bundles_post_ra>
